<compile_context>
chip_gen: v5e
topology: v5e:2x2
jax: 0.10.0
libtpu: 0.0.40
codegen_flags: <defaults>
</compile_context>

<pallas_src>
import math

import jax
import jax.numpy as jnp
from jax.experimental import pallas as pl
from jax.experimental.pallas import tpu as pltpu

_HALF_LOG_2PI = 0.5 * math.log(2.0 * math.pi)  # Python float -> inline constant


def _round_up(x: int, m: int) -> int:
    return ((x + m - 1) // m) * m


# -----------------------------------------------------------------------------
# Kernel 1: DeepNormal forward (eval mode) -> (mean, std), both [B, 1].
# -----------------------------------------------------------------------------
def _deep_normal_fwd_kernel(x_ref, w1_ref, b1_ref, w2_ref, b2_ref, w3_ref, b3_ref,
                            w4_ref, b4_ref, w5_ref, b5_ref, mean_ref, std_ref):
    hi = jax.lax.Precision.HIGHEST  # true-f32 MXU passes (matches the reference)
    x = x_ref[...].astype(jnp.float32)

    # shared layer; nn.Dropout() is the identity in eval mode.
    # TODO(synk): train-mode stochastic dropout not implemented.
    shared = jnp.maximum(
        jnp.dot(x, w1_ref[...], precision=hi, preferred_element_type=jnp.float32)
        + b1_ref[...], 0.0)

    # mean head: Linear -> ReLU -> Linear(n_hidden, 1)
    h_m = jnp.maximum(
        jnp.dot(shared, w2_ref[...], precision=hi, preferred_element_type=jnp.float32)
        + b2_ref[...], 0.0)
    # final (H -> 1) layer done as a lane reduce (avoids a degenerate N=1 matmul)
    mean_ref[...] = jnp.sum(h_m * w3_ref[...], axis=-1, keepdims=True) + b3_ref[...]

    # std head: Linear -> ReLU -> Linear(n_hidden, 1) -> Softplus
    h_s = jnp.maximum(
        jnp.dot(shared, w4_ref[...], precision=hi, preferred_element_type=jnp.float32)
        + b4_ref[...], 0.0)
    s = jnp.sum(h_s * w5_ref[...], axis=-1, keepdims=True) + b5_ref[...]
    std_ref[...] = jnp.maximum(s, 0.0) + jnp.log(1.0 + jnp.exp(-jnp.abs(s)))  # softplus


def deep_normal_forward(x, params):
    """Pallas version of DeepNormal.forward (eval mode): x -> (mean, std)."""
    B = x.shape[0]
    return pl.pallas_call(
        _deep_normal_fwd_kernel,
        out_shape=(jax.ShapeDtypeStruct((B, 1), jnp.float32),
                   jax.ShapeDtypeStruct((B, 1), jnp.float32)),
    )(x, params["w1"], params["b1"], params["w2"], params["b2"],
      params["w3"], params["b3"], params["w4"], params["b4"],
      params["w5"], params["b5"])


# -----------------------------------------------------------------------------
# Kernel 2: mean(-Normal(loc, scale).log_prob(target)) as a tiled reduction.
# -----------------------------------------------------------------------------
def _make_nll_kernel(*, n_rows, n_cols, tile_rows, tile_cols, rows_per_split, masked):
    sub_groups = tile_rows // 8

    def kernel(loc_ref, scale_ref, tgt_ref, acc_ref):
        i = pl.program_id(1)  # row-tile index within this split
        j = pl.program_id(2)  # col-tile index

        @pl.when((i == 0) & (j == 0))
        def _init():
            acc_ref[...] = jnp.zeros_like(acc_ref)

        loc = loc_ref[...].astype(jnp.float32)
        scale = scale_ref[...].astype(jnp.float32)
        tgt = tgt_ref[...].astype(jnp.float32)

        # -log_prob of Normal(loc, scale).  Exact divide on purpose: the kernel
        # is HBM-bound so pl.reciprocal(approx=True) would not change wall-clock
        # but its ~2^-12 error risks the 1e-5 accuracy check.
        z = (tgt - loc) / scale
        nll = 0.5 * (z * z) + jnp.log(scale) + _HALF_LOG_2PI

        if masked:  # zero-out wrapper padding rows/cols exactly
            c = pl.program_id(0)
            row0 = (c * rows_per_split + i) * tile_rows
            col0 = j * tile_cols
            rows = jax.lax.broadcasted_iota(jnp.int32, (tile_rows, tile_cols), 0) + row0
            cols = jax.lax.broadcasted_iota(jnp.int32, (tile_rows, tile_cols), 1) + col0
            nll = jnp.where((rows < n_rows) & (cols < n_cols), nll, 0.0)

        # VPU-only per-step accumulation into the lane-dense resident output
        # block: fold sublane groups, keep (8, tile_cols) partial sums.
        acc_ref[...] += nll.reshape(sub_groups, 8, tile_cols).sum(axis=0)

    return kernel


def normal_nll_loss(loc, scale, target, *, target_block_bytes=2 << 20, num_splits=2):
    """mean(-Normal(loc, scale).log_prob(target)) for 2-D [B, D] inputs."""
    assert loc.shape == scale.shape == target.shape and loc.ndim == 2
    B, D = loc.shape
    n_total = B * D

    # --- tile selection: MiB-scale blocks, v7x-safe (<= ~2 MiB/input default);
    #     pass a larger target_block_bytes on v5e/v6e (128 MiB VMEM) if desired.
    max_cols = max(128, (target_block_bytes // (8 * 4)) // 128 * 128)
    tile_cols = min(_round_up(D, 128), max_cols)
    d_pad = _round_up(D, tile_cols)
    n_col_tiles = d_pad // tile_cols

    tile_rows = max(8, min((target_block_bytes // (4 * tile_cols)) // 8 * 8,
                           _round_up(B, 8)))
    n_row_tiles = pl.cdiv(B, tile_rows)

    # Leading "parallel" axis: lets v7x split the row-tiles over its 2 TCs.
    num_splits = max(1, min(num_splits, n_row_tiles))
    n_row_tiles = _round_up(n_row_tiles, num_splits)
    rows_per_split = n_row_tiles // num_splits
    b_pad = n_row_tiles * tile_rows

    masked = (b_pad != B) or (d_pad != D)
    if masked:
        pad = ((0, b_pad - B), (0, d_pad - D))
        loc = jnp.pad(loc, pad)
        target = jnp.pad(target, pad)
        scale = jnp.pad(scale, pad, constant_values=1.0)  # keep log/div finite

    kernel = _make_nll_kernel(n_rows=B, n_cols=D, tile_rows=tile_rows,
                              tile_cols=tile_cols, rows_per_split=rows_per_split,
                              masked=masked)

    in_spec = pl.BlockSpec((tile_rows, tile_cols),
                           lambda c, i, j: (c * rows_per_split + i, j))

    # 3 inputs x 2 pipeline buffers x block + f32 intermediates + headroom.
    block_bytes_f32 = tile_rows * tile_cols * 4
    vmem_limit = int(min(max(10 * block_bytes_f32 + (4 << 20), 32 << 20), 64 << 20))

    partials = pl.pallas_call(
        kernel,
        out_shape=jax.ShapeDtypeStruct((num_splits * 8, tile_cols), jnp.float32),
        grid_spec=pltpu.PrefetchScalarGridSpec(
            num_scalar_prefetch=0,
            grid=(num_splits, rows_per_split, n_col_tiles),
            in_specs=[in_spec, in_spec, in_spec],
            # Same block per split across both reduction axes -> resident,
            # lane-dense accumulator; written back to HBM once per split.
            out_specs=pl.BlockSpec((8, tile_cols), lambda c, i, j: (c, 0)),
        ),
        compiler_params=pltpu.CompilerParams(
            dimension_semantics=("parallel", "arbitrary", "arbitrary"),
            vmem_limit_bytes=vmem_limit,
        ),
    )(loc, scale, target)

    # Final cross-lane reduce + 1/N once, outside the hot loop.
    return jnp.sum(partials) / n_total


if __name__ == "__main__":
    n_inputs, n_hidden, batch = 32, 32, 16
    keys = jax.random.split(jax.random.PRNGKey(0), 12)

    def init(k, shape, s=0.3):
        return s * jax.random.normal(k, shape, dtype=jnp.float32)

    params = {
        "w1": init(keys[0], (n_inputs, n_hidden)),
        "b1": init(keys[1], (1, n_hidden)),
        "w2": init(keys[2], (n_hidden, n_hidden)),
        "b2": init(keys[3], (1, n_hidden)),
        "w3": init(keys[4], (1, n_hidden)),   # final mean Linear(H, 1), stored (1, H)
        "b3": init(keys[5], (1, 1)),
        "w4": init(keys[6], (n_hidden, n_hidden)),
        "b4": init(keys[7], (1, n_hidden)),
        "w5": init(keys[8], (1, n_hidden)),   # final std Linear(H, 1), stored (1, H)
        "b5": init(keys[9], (1, 1)),
    }
    x = jax.random.normal(keys[10], (batch, n_inputs), dtype=jnp.float32)
    target = jax.random.normal(keys[11], (batch, 1), dtype=jnp.float32)

    # ---- Pallas forward: x -> Normal(mean, std) parameters --------------------
    mean, std = jax.block_until_ready(deep_normal_forward(x, params))

    hi = jax.lax.Precision.HIGHEST
    shared_r = jnp.maximum(jnp.dot(x, params["w1"], precision=hi) + params["b1"], 0.0)
    h_m = jnp.maximum(jnp.dot(shared_r, params["w2"], precision=hi) + params["b2"], 0.0)
    mean_r = jnp.sum(h_m * params["w3"], axis=-1, keepdims=True) + params["b3"]
    h_s = jnp.maximum(jnp.dot(shared_r, params["w4"], precision=hi) + params["b4"], 0.0)
    s_r = jnp.sum(h_s * params["w5"], axis=-1, keepdims=True) + params["b5"]
    std_r = jnp.maximum(s_r, 0.0) + jnp.log(1.0 + jnp.exp(-jnp.abs(s_r)))

    assert jnp.allclose(mean, mean_r, rtol=1e-4, atol=1e-4), (mean, mean_r)
    assert jnp.allclose(std, std_r, rtol=1e-4, atol=1e-4), (std, std_r)

    # ---- Pallas NLL of the predicted Normal at the targets ---------------------
    loss = jax.block_until_ready(normal_nll_loss(mean, std, target))
    ref = jnp.mean(0.5 * ((target - mean) / std) ** 2 + jnp.log(std) + _HALF_LOG_2PI)
    assert jnp.allclose(loss, ref, rtol=1e-5, atol=1e-5), (loss, ref)

    # ---- exercise the tiled / split / masked path at a small non-aligned shape --
    k2 = jax.random.split(jax.random.PRNGKey(1), 3)
    loc2 = jax.random.normal(k2[0], (40, 384), dtype=jnp.float32)
    scale2 = 0.5 + jax.random.uniform(k2[1], (40, 384), dtype=jnp.float32)
    tgt2 = jax.random.normal(k2[2], (40, 384), dtype=jnp.float32)
    loss2 = jax.block_until_ready(
        normal_nll_loss(loc2, scale2, tgt2, target_block_bytes=8 * 128 * 4))
    ref2 = jnp.mean(0.5 * ((tgt2 - loc2) / scale2) ** 2
                    + jnp.log(scale2) + _HALF_LOG_2PI)
    assert jnp.allclose(loss2, ref2, rtol=1e-5, atol=1e-5), (loss2, ref2)

    print("KERNEL_OK")
</pallas_src>

<mosaic_0001>
module attributes {stable_mosaic.version = 11 : i64} {
  func.func @_deep_normal_fwd_kernel(%arg0: memref<16x32xf32, #tpu.memory_space<vmem>>, %arg1: memref<32x32xf32, #tpu.memory_space<vmem>>, %arg2: memref<1x32xf32, #tpu.memory_space<vmem>>, %arg3: memref<32x32xf32, #tpu.memory_space<vmem>>, %arg4: memref<1x32xf32, #tpu.memory_space<vmem>>, %arg5: memref<1x32xf32, #tpu.memory_space<vmem>>, %arg6: memref<1x1xf32, #tpu.memory_space<vmem>>, %arg7: memref<32x32xf32, #tpu.memory_space<vmem>>, %arg8: memref<1x32xf32, #tpu.memory_space<vmem>>, %arg9: memref<1x32xf32, #tpu.memory_space<vmem>>, %arg10: memref<1x1xf32, #tpu.memory_space<vmem>>, %arg11: memref<16x1xf32, #tpu.memory_space<vmem>>, %arg12: memref<16x1xf32, #tpu.memory_space<vmem>>) attributes {dimension_semantics = [], scalar_prefetch = 0 : i64, scratch_operands = 0 : i64, tpu.core_type = #tpu.core_type<tc>} {
    %c0 = arith.constant 0 : index
    %c0_0 = arith.constant 0 : index
    %0 = vector.load %arg0[%c0, %c0_0] : memref<16x32xf32, #tpu.memory_space<vmem>>, vector<16x32xf32>
    %c0_1 = arith.constant 0 : index
    %c0_2 = arith.constant 0 : index
    %1 = vector.load %arg1[%c0_1, %c0_2] : memref<32x32xf32, #tpu.memory_space<vmem>>, vector<32x32xf32>
    %cst = arith.constant dense<0.000000e+00> : vector<16x32xf32>
    %2 = tpu.matmul %0, %1, %cst {dimension_numbers = #tpu.dot_dimension_numbers<[1], [0], [0], [1], [0, 0, 1, 1], [], []>, precision = #tpu.contract_precision<fp32>} : vector<16x32xf32>, vector<32x32xf32>, vector<16x32xf32> -> vector<16x32xf32>
    %c0_3 = arith.constant 0 : index
    %c0_4 = arith.constant 0 : index
    %3 = vector.load %arg2[%c0_3, %c0_4] : memref<1x32xf32, #tpu.memory_space<vmem>>, vector<1x32xf32>
    %4 = vector.broadcast %3 : vector<1x32xf32> to vector<16x32xf32>
    %5 = arith.addf %2, %4 : vector<16x32xf32>
    %cst_5 = arith.constant 0.000000e+00 : f32
    %6 = vector.broadcast %cst_5 : f32 to vector<16x32xf32>
    %7 = arith.maximumf %5, %6 : vector<16x32xf32>
    %c0_6 = arith.constant 0 : index
    %c0_7 = arith.constant 0 : index
    %8 = vector.load %arg3[%c0_6, %c0_7] : memref<32x32xf32, #tpu.memory_space<vmem>>, vector<32x32xf32>
    %cst_8 = arith.constant dense<0.000000e+00> : vector<16x32xf32>
    %9 = tpu.matmul %7, %8, %cst_8 {dimension_numbers = #tpu.dot_dimension_numbers<[1], [0], [0], [1], [0, 0, 1, 1], [], []>, precision = #tpu.contract_precision<fp32>} : vector<16x32xf32>, vector<32x32xf32>, vector<16x32xf32> -> vector<16x32xf32>
    %c0_9 = arith.constant 0 : index
    %c0_10 = arith.constant 0 : index
    %10 = vector.load %arg4[%c0_9, %c0_10] : memref<1x32xf32, #tpu.memory_space<vmem>>, vector<1x32xf32>
    %11 = vector.broadcast %10 : vector<1x32xf32> to vector<16x32xf32>
    %12 = arith.addf %9, %11 : vector<16x32xf32>
    %cst_11 = arith.constant 0.000000e+00 : f32
    %13 = vector.broadcast %cst_11 : f32 to vector<16x32xf32>
    %14 = arith.maximumf %12, %13 : vector<16x32xf32>
    %c0_12 = arith.constant 0 : index
    %c0_13 = arith.constant 0 : index
    %15 = vector.load %arg5[%c0_12, %c0_13] : memref<1x32xf32, #tpu.memory_space<vmem>>, vector<1x32xf32>
    %16 = vector.broadcast %15 : vector<1x32xf32> to vector<16x32xf32>
    %17 = arith.mulf %14, %16 : vector<16x32xf32>
    %cst_14 = arith.constant dense<0.000000e+00> : vector<16xf32>
    %18 = vector.multi_reduction <add>, %17, %cst_14 [1] : vector<16x32xf32> to vector<16xf32>
    %19 = vector.shape_cast %18 : vector<16xf32> to vector<16x1xf32>
    %c0_15 = arith.constant 0 : index
    %c0_16 = arith.constant 0 : index
    %20 = vector.load %arg6[%c0_15, %c0_16] : memref<1x1xf32, #tpu.memory_space<vmem>>, vector<1x1xf32>
    %21 = vector.broadcast %20 : vector<1x1xf32> to vector<16x1xf32>
    %22 = arith.addf %19, %21 : vector<16x1xf32>
    %c0_17 = arith.constant 0 : index
    %c0_18 = arith.constant 0 : index
    %23 = vector.load %arg11[%c0_17, %c0_18] : memref<16x1xf32, #tpu.memory_space<vmem>>, vector<16x1xf32>
    tpu.vector_store %arg11[%c0_17, %c0_18], %22 {strides = array<i32>} : memref<16x1xf32, #tpu.memory_space<vmem>>, vector<16x1xf32>,
    %c0_19 = arith.constant 0 : index
    %c0_20 = arith.constant 0 : index
    %24 = vector.load %arg7[%c0_19, %c0_20] : memref<32x32xf32, #tpu.memory_space<vmem>>, vector<32x32xf32>
    %cst_21 = arith.constant dense<0.000000e+00> : vector<16x32xf32>
    %25 = tpu.matmul %7, %24, %cst_21 {dimension_numbers = #tpu.dot_dimension_numbers<[1], [0], [0], [1], [0, 0, 1, 1], [], []>, precision = #tpu.contract_precision<fp32>} : vector<16x32xf32>, vector<32x32xf32>, vector<16x32xf32> -> vector<16x32xf32>
    %c0_22 = arith.constant 0 : index
    %c0_23 = arith.constant 0 : index
    %26 = vector.load %arg8[%c0_22, %c0_23] : memref<1x32xf32, #tpu.memory_space<vmem>>, vector<1x32xf32>
    %27 = vector.broadcast %26 : vector<1x32xf32> to vector<16x32xf32>
    %28 = arith.addf %25, %27 : vector<16x32xf32>
    %cst_24 = arith.constant 0.000000e+00 : f32
    %29 = vector.broadcast %cst_24 : f32 to vector<16x32xf32>
    %30 = arith.maximumf %28, %29 : vector<16x32xf32>
    %c0_25 = arith.constant 0 : index
    %c0_26 = arith.constant 0 : index
    %31 = vector.load %arg9[%c0_25, %c0_26] : memref<1x32xf32, #tpu.memory_space<vmem>>, vector<1x32xf32>
    %32 = vector.broadcast %31 : vector<1x32xf32> to vector<16x32xf32>
    %33 = arith.mulf %30, %32 : vector<16x32xf32>
    %cst_27 = arith.constant dense<0.000000e+00> : vector<16xf32>
    %34 = vector.multi_reduction <add>, %33, %cst_27 [1] : vector<16x32xf32> to vector<16xf32>
    %35 = vector.shape_cast %34 : vector<16xf32> to vector<16x1xf32>
    %c0_28 = arith.constant 0 : index
    %c0_29 = arith.constant 0 : index
    %36 = vector.load %arg10[%c0_28, %c0_29] : memref<1x1xf32, #tpu.memory_space<vmem>>, vector<1x1xf32>
    %37 = vector.broadcast %36 : vector<1x1xf32> to vector<16x1xf32>
    %38 = arith.addf %35, %37 : vector<16x1xf32>
    %cst_30 = arith.constant 0.000000e+00 : f32
    %39 = vector.broadcast %cst_30 : f32 to vector<16x1xf32>
    %40 = arith.maximumf %38, %39 : vector<16x1xf32>
    %41 = math.absf %38 : vector<16x1xf32>
    %cst_31 = arith.constant 0.000000e+00 : f32
    %42 = vector.broadcast %cst_31 : f32 to vector<16x1xf32>
    %43 = arith.subf %42, %41 : vector<16x1xf32>
    %44 = math.exp %43 : vector<16x1xf32>
    %cst_32 = arith.constant 1.000000e+00 : f32
    %45 = vector.broadcast %cst_32 : f32 to vector<16x1xf32>
    %46 = arith.addf %45, %44 : vector<16x1xf32>
    %47 = math.log %46 : vector<16x1xf32>
    %48 = arith.addf %40, %47 : vector<16x1xf32>
    %c0_33 = arith.constant 0 : index
    %c0_34 = arith.constant 0 : index
    %49 = vector.load %arg12[%c0_33, %c0_34] : memref<16x1xf32, #tpu.memory_space<vmem>>, vector<16x1xf32>
    tpu.vector_store %arg12[%c0_33, %c0_34], %48 {strides = array<i32>} : memref<16x1xf32, #tpu.memory_space<vmem>>, vector<16x1xf32>,
    return
  }
}

</mosaic_0001>

<bundles_post_ra>
// kernel: tpu_custom_call.1
= control target key start
LH: loop header
LB: loop body
LE: loop exit
PB: predicated region body
PF: predicated region fallthrough
CT: control target
= control target key end

     0   :  { %s1200_s0 = inlined_call_operand.hbm [shape: f32[16,32], index: 0, kind: input, shape index: {}]   ;;  %s1201_s1 = inlined_call_operand.hbm [shape: f32[32,32], index: 1, kind: input, shape index: {}]   ;;  %s1202_s2 = inlined_call_operand.vmem [shape: f32[1,32], index: 2, kind: input, shape index: {}]   ;;  %s1203_s3 = inlined_call_operand.hbm [shape: f32[32,32], index: 3, kind: input, shape index: {}]   ;;  %s1204_s4 = inlined_call_operand.vmem [shape: f32[1,32], index: 4, kind: input, shape index: {}]   ;;  %s1205_s5 = inlined_call_operand.vmem [shape: f32[1,32], index: 5, kind: input, shape index: {}]   ;;  %s1206_s6 = inlined_call_operand.<no memory space> [shape: f32[1,1], index: 6, kind: input, shape index: {}]   ;;  %s1207_s7 = inlined_call_operand.hbm [shape: f32[32,32], index: 7, kind: input, shape index: {}]   ;;  %s1208_s8 = inlined_call_operand.vmem [shape: f32[1,32], index: 8, kind: input, shape index: {}]   ;;  %s1209_s9 = inlined_call_operand.vmem [shape: f32[1,32], index: 9, kind: input, shape index: {}]   ;;  %s1210_s11 = inlined_call_operand.vmem [shape: f32[16,1], index: 11, kind: output, shape index: {0}]   ;;  %s1211_s12 = inlined_call_operand.vmem [shape: f32[16,1], index: 12, kind: output, shape index: {1}]   ;;  %s1212_s10 = inlined_call_operand.<no memory space> [shape: f32[1,1], index: 10, kind: input, shape index: {}]  }
   0x1   :  { %v18_v0 = vstv %s1206_s6  ;;  %v20_v1 = vstv %s1212_s10 }
   0x2   :  { %19 = vst [vmem:[#allocation2] sm:$0x1] %v18_v0 }
   0x3   :  { %21 = vst [vmem:[#allocation3] sm:$0x1] %v20_v1 }
   0x4   :  { %22 = vsyncpa [#allocation5], 0 }
   0x5   :  { %23 = vsyncpa [#allocation7], 0 }
   0x6   :  { %24 = vsyncpa [#allocation10], 0  ;;  %s42_s27 = sshll.u32 %s1201_s1, 4  ;;  %s1001_s28 = smov [#allocation6]   ;;  %s43_s27 = int_to_ptr.hbm [resolvable:$true] %s42_s27 }
   0x7   :  { %s44_s29 = sshll.u32 %s1001_s28, 4  ;;  %s29_s6 = sshll.u32 %s1200_s0, 4  ;;  %s45_s29 = int_to_ptr.vmem [resolvable:$true] %s44_s29  ;;  %s30_s6 = int_to_ptr.hbm [resolvable:$true] %s29_s6 }
   0x8   :  { %s1002_s14 = smov 128   ;;  %s1003_s15 = smov 8  }
   0x9   :  { %50 = dma.hbm_to_vmem [thread:$0]  %s43_s27, 512, %s45_s29, [#allocation7], %s1002_s14, %s1002_s14, %s1003_s15  }
   0xa   :  { %s1004_s10 = smov [#allocation4]   ;;  %s57_s19 = sshll.u32 %s1203_s3, 4  ;;  %s58_s19 = int_to_ptr.hbm [resolvable:$true] %s57_s19 }
   0xb   :  { %s31_s16 = sshll.u32 %s1004_s10, 4  ;;  %s76_s21 = sshll.u32 %s1207_s7, 4  ;;  %s32_s16 = int_to_ptr.vmem [resolvable:$true] %s31_s16  ;;  %s77_s21 = int_to_ptr.hbm [resolvable:$true] %s76_s21 }
   0xc   :  { %37 = dma.hbm_to_vmem [thread:$0]  %s30_s6, 256, %s32_s16, [#allocation5], %s1002_s14, %s1002_s14, %s1003_s15  }
   0xd   :  { %s1005_s22 = smov [#allocation8]   ;;  %s1006_s0 = smov [#allocation9]  }
   0xe   :  { %s59_s23 = sshll.u32 %s1005_s22, 4  ;;  %s78_s24 = sshll.u32 %s1006_s0, 4  ;;  %s60_s23 = int_to_ptr.vmem [resolvable:$true] %s59_s23  ;;  %s79_s24 = int_to_ptr.vmem [resolvable:$true] %s78_s24 }
   0xf   :  { %65 = dma.hbm_to_vmem [thread:$0]  %s58_s19, 512, %s60_s23, [#allocation7], %s1002_s14, %s1002_s14, %s1003_s15  }
  0x10   :  { %84 = dma.hbm_to_vmem [thread:$0]  %s77_s21, 512, %s79_s24, [#allocation10], %s1002_s14, %s1002_s14, %s1003_s15  }
  0x11   :  { %995 = dma.done.wait [#allocation5], 256  }
  0x12   :  { %996 = vsyncadd [#allocation5], 4294967040 }
  0x13   :  { %997 = dma.done.wait [#allocation7], 1024  }
  0x14   :  { %998 = vsyncadd [#allocation7], 4294966272 }
  0x15   :  { %999 = dma.done.wait [#allocation10], 512  }
  0x16   :  { %1000 = vsyncadd [#allocation10], 4294966784  ;;  %vm117_vm0 = vcmask 261120   ;;  %v112_v2 = vld [vmem:[#allocation6 + $0x18] sm:$0xff]  ;;  %v111_v3 = vld [vmem:[#allocation6 + $0x10] sm:$0xff]  ;;  %vm592_vm1 = vcmask 7168  }
  0x17   :  { %v110_v4 = vld [vmem:[#allocation6 + $0x8] sm:$0xff]  ;;  %v136_v5 = vand.u32 4294901760, %v112_v2  ;;  %v1090_v6 = vand.u32 4294901760, %v111_v3  ;;  %v109_v8 = vld [vmem:[#allocation6] sm:$0xff]  ;;  %v108_v9 = vld [vmem:[#allocation4 + $0x8] sm:$0xff] }
  0x18   :  { %v1092_v7 = vand.u32 4294901760, %v110_v4  ;;  %v107_v10 = vld [vmem:[#allocation4] sm:$0xff]  ;;  %v1094_v11 = vand.u32 4294901760, %v109_v8  ;;  %v122_v12 = vsel %vm117_vm0, %v108_v9, 0  ;;  %v345_v40 = vld [vmem:[#allocation8 + $0x18] sm:$0xff]  ;;  %v343_v45 = vld [vmem:[#allocation8 + $0x8] sm:$0xff] }
  0x19   :  { %v119_v13 = vsel %vm117_vm0, %v107_v10, 0  ;;  %870 = vmatpush.msra.mxu2 %v136_v5  ;;  %v174_v14 = vsub.f32 %v112_v2, %v136_v5  ;;  %v1098_v15 = vand.u32 4294901760, %v122_v12  ;;  %v180_v16 = vsub.f32 %v111_v3, %v1090_v6  ;;  %137 = vmatpush.msra.mxu0 %v136_v5  ;;  %v344_v42 = vld [vmem:[#allocation8 + $0x10] sm:$0xff]  ;;  %v342_v49 = vld [vmem:[#allocation8] sm:$0xff]  ;;  %v598_v0 = vld [vmem:[#allocation9 + $0x18] sm:$0xff] }
  0x1a   :  { %v186_v17 = vsub.f32 %v110_v4, %v1092_v7  ;;  %v192_v18 = vsub.f32 %v109_v8, %v1094_v11  ;;  %v144_v19 = vand.u32 4294901760, %v119_v13  ;;  %v368_v41 = vand.u32 4294901760, %v345_v40  ;;  %v597_v2 = vld [vmem:[#allocation9 + $0x10] sm:$0xff]  ;;  %v596_v8 = vld [vmem:[#allocation9 + $0x8] sm:$0xff] }
  0x1b   :  { %871 = vmatpush.msra.mxu2 %v1090_v6  ;;  %v175_v20 = vand.u32 4294901760, %v174_v14  ;;  %v153_v21 = vsub.f32 %v122_v12, %v1098_v15  ;;  %v181_v22 = vand.u32 4294901760, %v180_v16  ;;  %139 = vmatpush.msra.mxu0 %v1090_v6  ;;  %v370_v44 = vand.u32 4294901760, %v344_v42 }
  0x1c   :  { %v187_v23 = vand.u32 4294901760, %v186_v17  ;;  %v193_v24 = vand.u32 4294901760, %v192_v18  ;;  %v145_v25 = vsub.f32 %v119_v13, %v144_v19  ;;  %v406_v43 = vsub.f32 %v345_v40, %v368_v41  ;;  %v595_v13 = vld [vmem:[#allocation9] sm:$0xff] }
  0x1d   :  { %872 = vmatpush.msra.mxu2 %v1092_v7  ;;  %v176_v26 = vsub.f32 %v174_v14, %v175_v20  ;;  %v154_v27 = vand.u32 4294901760, %v153_v21  ;;  %v182_v28 = vsub.f32 %v180_v16, %v181_v22  ;;  %141 = vmatpush.msra.mxu0 %v1092_v7  ;;  %v412_v47 = vsub.f32 %v344_v42, %v370_v44 }
  0x1e   :  { %v188_v29 = vsub.f32 %v186_v17, %v187_v23  ;;  %v146_v30 = vand.u32 4294901760, %v145_v25  ;;  %v194_v34 = vsub.f32 %v192_v18, %v193_v24  ;;  %v407_v46 = vand.u32 4294901760, %v406_v43 }
  0x1f   :  { %873 = vmatpush.msra.mxu2 %v1094_v11  ;;  %v177_v31 = vand.u32 4294901760, %v176_v26  ;;  %v155_v32 = vsub.f32 %v153_v21, %v154_v27  ;;  %v183_v33 = vand.u32 4294901760, %v182_v28  ;;  %143 = vmatpush.msra.mxu0 %v1094_v11  ;;  %v372_v48 = vand.u32 4294901760, %v343_v45 }
  0x20   :  { %v147_v35 = vsub.f32 %v145_v25, %v146_v30  ;;  %v189_v37 = vand.u32 4294901760, %v188_v29  ;;  %v195_v39 = vand.u32 4294901760, %v194_v34  ;;  %v408_v50 = vsub.f32 %v406_v43, %v407_v46 }
  0x21   :  { %220 = vmatpush.msrb.mxu2 %v174_v14  ;;  %289 = vmatpush.msrb.mxu0 %v175_v20  ;;  %v156_v36 = vand.u32 4294901760, %v155_v32  ;;  %v413_v51 = vand.u32 4294901760, %v412_v47  ;;  %v418_v52 = vsub.f32 %v343_v45, %v372_v48  ;;  %v374_v53 = vand.u32 4294901760, %v342_v49 }
  0x22   :  { %874 = vmatpush.msra.mxu3 %v177_v31  ;;  %178 = vmatpush.msra.mxu1 %v177_v31  ;;  %v148_v38 = vand.u32 4294901760, %v147_v35  ;;  %v409_v54 = vand.u32 4294901760, %v408_v50  ;;  %v1119_v1 = vand.u32 4294901760, %v598_v0  ;;  %v1132_v10 = vand.u32 4294901760, %v596_v8 }
  0x23   :  { %223 = vmatpush.msrb.mxu2 %v180_v16  ;;  %293 = vmatpush.msrb.mxu0 %v181_v22  ;;  %v414_v55 = vsub.f32 %v412_v47, %v413_v51  ;;  %v419_v56 = vand.u32 4294901760, %v418_v52  ;;  %v424_v57 = vsub.f32 %v342_v49, %v374_v53  ;;  %v1139_v16 = vand.u32 4294901760, %v595_v13 }
  0x24   :  { %157 = vmatmul.f32.vlgmr.msra.gmra.mxu2 %v156_v36  ;;  %875 = vmatpush.msra.mxu3 %v183_v33  ;;  %v1123_v4 = vsub.f32 %v598_v0, %v1119_v1 }
  0x25   :  { %226 = vmatpush.msrb.mxu2 %v186_v17  ;;  %184 = vmatpush.msra.mxu1 %v183_v33  ;;  %v415_v58 = vand.u32 4294901760, %v414_v55  ;;  %v420_v59 = vsub.f32 %v418_v52, %v419_v56  ;;  %v425_v60 = vand.u32 4294901760, %v424_v57  ;;  %v1142_v17 = vsub.f32 %v596_v8, %v1132_v10 }
  0x26   :  { %876 = vmatpush.msra.mxu3 %v189_v37  ;;  %149 = vmatmul.f32.vlgmr.msra.gmra.mxu0 %v148_v38  ;;  %v654_v9 = vand.u32 4294901760, %v1123_v4  ;;  %v1148_v22 = vsub.f32 %v595_v13, %v1139_v16 }
  0x27   :  { %229 = vmatpush.msrb.mxu2 %v192_v18  ;;  %190 = vmatpush.msra.mxu1 %v189_v37  ;;  %v421_v61 = vand.u32 4294901760, %v420_v59  ;;  %v426_v62 = vsub.f32 %v424_v57, %v425_v60 }
  0x28   :  { %877 = vmatpush.msra.mxu3 %v195_v39  ;;  %297 = vmatpush.msrb.mxu0 %v187_v23  ;;  %v672_v26 = vand.u32 4294901760, %v1148_v22 }
  0x29   :  { %202 = vmatmul.f32.vlgmr.msra.gmra.mxu3 %v1098_v15  ;;  %196 = vmatpush.msra.mxu1 %v195_v39  ;;  %v427_v63 = vand.u32 4294901760, %v426_v62 }
  0x2a   :  { %254 = vmatpush.msrb.mxu3 %v136_v5  ;;  %198 = vmatmul.f32.vlgmr.msra.gmra.mxu1 %v144_v19 }
  0x2b   :  { %324 = vmatpush.msrb.mxu1 %v136_v5  ;;  %301 = vmatpush.msrb.mxu0 %v193_v24  ;;  %v1125_v5 = vand.u32 4294901760, %v597_v2 }
  0x2c   :  { %232 = vmatmul.f32.vlgmr.msrb.gmra.mxu2 %v145_v25  ;;  %256 = vmatpush.msrb.mxu3 %v1090_v6 }
  0x2d   :  { %326 = vmatpush.msrb.mxu1 %v1090_v6  ;;  %369 = vmatpush.msra.mxu2 %v368_v41  ;;  %v884_v6 = vld [vmem:[%s1202_s2] ss:$0 sm:$0xff]  ;;  %v1135_v12 = vsub.f32 %v597_v2, %v1125_v5 }
  0x2e   :  { %258 = vmatpush.msrb.mxu3 %v1092_v7  ;;  %303 = vmatmul.f32.vlgmr.msrb.gmra.mxu0 %v144_v19  ;;  %v885_v2 = vld [vmem:[%s1204_s4] ss:$0 sm:$0xff] }
  0x2f   :  { %328 = vmatpush.msrb.mxu1 %v1092_v7  ;;  %452 = vmatpush.msra.mxu0 %v406_v43  ;;  %v660_v18 = vand.u32 4294901760, %v1135_v12 }
  0x30   :  { %260 = vmatpush.msrb.mxu3 %v1094_v11  ;;  %371 = vmatpush.msra.mxu2 %v370_v44 }
  0x31   :  { %264 = vmatmul.f32.vlgmr.msrb.gmra.mxu3 %v146_v30  ;;  %330 = vmatpush.msrb.mxu1 %v1094_v11  ;;  %v661_v24 = vsub.f32 %v1135_v12, %v660_v18  ;;  %v673_v30 = vsub.f32 %v1148_v22, %v672_v26 }
  0x32   :  { %332 = vmatmul.f32.vlgmr.msrb.gmra.mxu1 %v144_v19  ;;  %455 = vmatpush.msra.mxu0 %v412_v47 }
  0x33   :  { %486 = vmatpush.msra.mxu1 %v368_v41  ;;  %373 = vmatpush.msra.mxu2 %v372_v48  ;;  %v662_v28 = vand.u32 4294901760, %v661_v24  ;;  %v674_v33 = vand.u32 4294901760, %v673_v30  ;;  %v886_v24 = vld [vmem:[%s1208_s8] ss:$0 sm:$0xff] }
  0x34   :  { %237 = vmatmul.f32.gmra.mxu2 %v153_v21  ;;  %458 = vmatpush.msra.mxu0 %v418_v52  ;;  %v666_v21 = vand.u32 4294901760, %v1142_v17 }
  0x35   :  { %488 = vmatpush.msra.mxu1 %v370_v44  ;;  %375 = vmatpush.msra.mxu2 %v374_v53 }
  0x36   :  { %307 = vmatmul.f32.gmra.mxu0 %v1098_v15  ;;  %410 = vmatpush.msra.mxu3 %v409_v54  ;;  %v667_v25 = vsub.f32 %v1142_v17, %v666_v21 }
  0x37   :  { %490 = vmatpush.msra.mxu1 %v372_v48  ;;  %521 = vmatpush.msrb.mxu2 %v407_v46 }
  0x38   :  { %461 = vmatpush.msra.mxu0 %v424_v57  ;;  %416 = vmatpush.msra.mxu3 %v415_v58  ;;  %v668_v29 = vand.u32 4294901760, %v667_v25 }
  0x39   :  { %270 = vmatmul.f32.gmra.mxu3 %v154_v27  ;;  %492 = vmatpush.msra.mxu1 %v374_v53 }
  0x3a   :  { %336 = vmatmul.f32.gmra.mxu1 %v1098_v15  ;;  %525 = vmatpush.msrb.mxu2 %v413_v51  ;;  %v655_v15 = vsub.f32 %v1123_v4, %v654_v9 }
  0x3b   :  { %422 = vmatpush.msra.mxu3 %v421_v61  ;;  %616 = vmatpush.msrb.mxu0 %v1119_v1 }
  0x3c   :  { %529 = vmatpush.msrb.mxu2 %v419_v56  ;;  %v656_v20 = vand.u32 4294901760, %v655_v15 }
  0x3d   :  { %428 = vmatpush.msra.mxu3 %v427_v63  ;;  %618 = vmatpush.msrb.mxu0 %v1125_v5 }
  0x3e   :  { %533 = vmatpush.msrb.mxu2 %v425_v60  ;;  %657 = vmatpush.msrb.mxu1 %v656_v20 }
  0x3f   :  { %556 = vmatpush.msrb.mxu3 %v368_v41  ;;  %620 = vmatpush.msrb.mxu0 %v1132_v10 }
  0x40   :  { %663 = vmatpush.msrb.mxu1 %v662_v28 }
  0x41   :  { %558 = vmatpush.msrb.mxu3 %v370_v44  ;;  %622 = vmatpush.msrb.mxu0 %v1139_v16 }
  0x42   :  { %669 = vmatpush.msrb.mxu1 %v668_v29 }
  0x43   :  { %560 = vmatpush.msrb.mxu3 %v372_v48 }
  0x44   :  { %675 = vmatpush.msrb.mxu1 %v674_v33 }
  0x45   :  { %562 = vmatpush.msrb.mxu3 %v374_v53 }
  0xa3   :  { %v150_v3 = vpop.f32.mrf.mxu0 }
  0xa4   :  { %v151_v11 = vadd.f32 %v884_v6, %v150_v3 }
  0xa7   :  { %v158_v7 = vpop.f32.mrf.mxu2  ;;  %v199_v14 = vpop.f32.mrf.mxu1 }
  0xa8   :  { %v200_v23 = vadd.f32 %v199_v14, %v151_v11  ;;  %v159_v36 = vadd.f32 %v884_v6, %v158_v7 }
  0xab   :  { %v304_v32 = vpop.f32.mrf.mxu0 }
  0xac   :  { %v203_v19 = vpop.f32.mrf.mxu3 }
  0xad   :  { %v204_v40 = vadd.f32 %v203_v19, %v159_v36 }
  0xaf   :  { %v233_v27 = vpop.f32.mrf.mxu2  ;;  %v333_v35 = vpop.f32.mrf.mxu1 }
  0xb0   :  { %v234_v31 = vadd.f32 %v233_v27, %v200_v23 }
  0xb3   :  { %v308_v45 = vpop.f32.mrf.mxu0 }
  0xb4   :  { %v265_v34 = vpop.f32.mrf.mxu3 }
  0xb5   :  { %v266_v37 = vadd.f32 %v265_v34, %v234_v31 }
  0xb7   :  { %v305_v38 = vadd.f32 %v304_v32, %v266_v37  ;;  %v238_v39 = vpop.f32.mrf.mxu2  ;;  %v337_v49 = vpop.f32.mrf.mxu1 }
  0xb8   :  { %v239_v42 = vadd.f32 %v238_v39, %v204_v40 }
  0xb9   :  { %v334_v41 = vadd.f32 %v333_v35, %v305_v38 }
  0xbb   :  { %v340_v43 = vmax.f32 %v334_v41, 0.0 }
  0xbc   :  { %v271_v44 = vpop.f32.mrf.mxu3 }
  0xbd   :  { %v351_v46 = vsel %vm117_vm0, %v340_v43, 0  ;;  %v272_v47 = vadd.f32 %v271_v44, %v239_v42 }
  0xbe   :  { %v376_v48 = vand.u32 4294901760, %v351_v46 }
  0xbf   :  { %v309_v50 = vadd.f32 %v308_v45, %v272_v47 }
  0xc0   :  { %v377_v51 = vsub.f32 %v351_v46, %v376_v48  ;;  %430 = vmatmul.f32.vlgmr.msra.gmra.mxu3 %v376_v48 }
  0xc1   :  { %v338_v52 = vadd.f32 %v337_v49, %v309_v50  ;;  %733 = vmatpush.msra.mxu3 %v1119_v1 }
  0xc2   :  { %464 = vmatmul.f32.vlgmr.msra.gmra.mxu0 %v377_v51  ;;  %v378_v53 = vand.u32 4294901760, %v377_v51 }
  0xc3   :  { %v341_v54 = vmax.f32 %v338_v52, 0.0  ;;  %735 = vmatpush.msra.mxu3 %v1125_v5  ;;  %768 = vmatpush.msra.mxu0 %v654_v9 }
  0xc4   :  { %496 = vmatmul.f32.vlgmr.msra.gmra.mxu1 %v378_v53  ;;  %v379_v55 = vsub.f32 %v377_v51, %v378_v53 }
  0xc5   :  { %v354_v56 = vsel %vm117_vm0, %v341_v54, 0  ;;  %737 = vmatpush.msra.mxu3 %v1132_v10  ;;  %772 = vmatpush.msra.mxu0 %v660_v18 }
  0xc6   :  { %v384_v57 = vand.u32 4294901760, %v354_v56  ;;  %v380_v58 = vand.u32 4294901760, %v379_v55  ;;  %803 = vmatpush.msra.mxu1 %v1119_v1 }
  0xc7   :  { %739 = vmatpush.msra.mxu3 %v1139_v16  ;;  %776 = vmatpush.msra.mxu0 %v666_v21  ;;  %v887_v21 = vld [vmem:[%s1205_s5] ss:$0 sm:$0xff] }
  0xc8   :  { %v385_v59 = vsub.f32 %v354_v56, %v384_v57  ;;  %381 = vmatmul.f32.vlgmr.msra.gmra.mxu2 %v380_v58  ;;  %434 = vmatmul.f32.gmra.mxu3 %v384_v57 }
  0xc9   :  { %699 = vmatpush.msra.mxu2 %v1123_v4  ;;  %805 = vmatpush.msra.mxu1 %v1125_v5 }
  0xca   :  { %469 = vmatmul.f32.gmra.mxu0 %v385_v59  ;;  %v386_v60 = vand.u32 4294901760, %v385_v59 }
  0xcb   :  { %702 = vmatpush.msra.mxu2 %v1135_v12  ;;  %780 = vmatpush.msra.mxu0 %v672_v26 }
  0xcc   :  { %502 = vmatmul.f32.gmra.mxu1 %v386_v60  ;;  %v387_v61 = vsub.f32 %v385_v59, %v386_v60 }
  0xcd   :  { %705 = vmatpush.msra.mxu2 %v1142_v17  ;;  %807 = vmatpush.msra.mxu1 %v1132_v10 }
  0xce   :  { %v388_v62 = vand.u32 4294901760, %v387_v61 }
  0xcf   :  { %809 = vmatpush.msra.mxu1 %v1139_v16  ;;  %708 = vmatpush.msra.mxu2 %v1148_v22 }
  0xd0   :  { %389 = vmatmul.f32.gmra.mxu2 %v388_v62  ;;  %564 = vmatmul.f32.vlgmr.msrb.gmra.mxu3 %v376_v48 }
  0xd2   :  { %628 = vmatmul.f32.vlgmr.msrb.gmra.mxu0 %v380_v58 }
  0xd4   :  { %677 = vmatmul.f32.vlgmr.msrb.gmra.mxu1 %v376_v48 }
  0xd8   :  { %535 = vmatmul.f32.vlgmr.msrb.gmra.mxu2 %v376_v48  ;;  %568 = vmatmul.f32.gmra.mxu3 %v384_v57 }
  0xda   :  { %636 = vmatmul.f32.gmra.mxu0 %v388_v62 }
  0xdc   :  { %681 = vmatmul.f32.gmra.mxu1 %v384_v57 }
  0xe0   :  { %539 = vmatmul.f32.gmra.mxu2 %v384_v57  ;;  %743 = vmatmul.f32.vlgmr.msra.gmra.mxu3 %v378_v53 }
  0xe2   :  { %782 = vmatmul.f32.vlgmr.msra.gmra.mxu0 %v376_v48 }
  0xe4   :  { %811 = vmatmul.f32.vlgmr.msra.gmra.mxu1 %v376_v48  ;;  %v888_v48 = vld [vmem:[%s1209_s9] ss:$0 sm:$0xff] }
  0xe8   :  { %711 = vmatmul.f32.vlgmr.msra.gmra.mxu2 %v377_v51  ;;  %749 = vmatmul.f32.gmra.mxu3 %v386_v60 }
  0xea   :  { %786 = vmatmul.f32.gmra.mxu0 %v384_v57 }
  0xec   :  { %815 = vmatmul.f32.gmra.mxu1 %v384_v57 }
  0xf0   :  { %716 = vmatmul.f32.gmra.mxu2 %v385_v59 }
 0x13f   :  { %v465_v0 = vpop.f32.mrf.mxu0 }
 0x141   :  { %v497_v1 = vpop.f32.mrf.mxu1 }
 0x143   :  { %v431_v63 = vpop.f32.mrf.mxu3 }
 0x147   :  { %v470_v6 = vpop.f32.mrf.mxu0 }
 0x149   :  { %v503_v7 = vpop.f32.mrf.mxu1 }
 0x14b   :  { %v382_v3 = vpop.f32.mrf.mxu2  ;;  %v435_v4 = vpop.f32.mrf.mxu3 }
 0x14c   :  { %v383_v5 = vadd.f32 %v885_v2, %v382_v3 }
 0x14e   :  { %v432_v8 = vadd.f32 %v431_v63, %v383_v5  ;;  %v889_v63 = vld [vmem:[#allocation2] ss:$0 sm:$0xff] }
 0x14f   :  { %v629_v13 = vpop.f32.mrf.mxu0 }
 0x150   :  { %v466_v11 = vadd.f32 %v465_v0, %v432_v8  ;;  %v630_v32 = vadd.f32 %v886_v24, %v629_v13 }
 0x151   :  { %v678_v16 = vpop.f32.mrf.mxu1 }
 0x152   :  { %v498_v15 = vadd.f32 %v497_v1, %v466_v11  ;;  %v679_v35 = vadd.f32 %v678_v16, %v630_v32 }
 0x153   :  { %v390_v9 = vpop.f32.mrf.mxu2  ;;  %v565_v12 = vpop.f32.mrf.mxu3 }
 0x154   :  { %v391_v10 = vadd.f32 %v885_v2, %v390_v9 }
 0x156   :  { %v436_v14 = vadd.f32 %v435_v4, %v391_v10  ;;  %v890_v4 = vld [vmem:[#allocation3] ss:$0 sm:$0xff] }
 0x157   :  { %v637_v27 = vpop.f32.mrf.mxu0 }
 0x158   :  { %v471_v20 = vadd.f32 %v470_v6, %v436_v14  ;;  %v638_v42 = vadd.f32 %v886_v24, %v637_v27 }
 0x159   :  { %v682_v31 = vpop.f32.mrf.mxu1 }
 0x15a   :  { %v504_v25 = vadd.f32 %v503_v7, %v471_v20  ;;  %v683_v46 = vadd.f32 %v682_v31, %v638_v42 }
 0x15b   :  { %v536_v17 = vpop.f32.mrf.mxu2  ;;  %v569_v23 = vpop.f32.mrf.mxu3 }
 0x15c   :  { %v537_v18 = vadd.f32 %v536_v17, %v498_v15 }
 0x15e   :  { %v566_v19 = vadd.f32 %v565_v12, %v537_v18 }
 0x15f   :  { %v783_v41 = vpop.f32.mrf.mxu0 }
 0x160   :  { %v572_v22 = vmax.f32 %v566_v19, 0.0 }
 0x161   :  { %v812_v44 = vpop.f32.mrf.mxu1 }
 0x162   :  { %v578_v26 = vmul.f32 %v887_v21, %v572_v22 }
 0x163   :  { %v540_v28 = vpop.f32.mrf.mxu2  ;;  %v744_v37 = vpop.f32.mrf.mxu3 }
 0x164   :  { %v541_v29 = vadd.f32 %v540_v28, %v504_v25  ;;  %v580_v30 = vsel %vm117_vm0, %v578_v26, 0.0 }
 0x165   :  { %581 = vadd.xlane.f32.xlu1 %v580_v30 }
 0x166   :  { %v570_v33 = vadd.f32 %v569_v23, %v541_v29 }
 0x167   :  { %v787_v55 = vpop.f32.mrf.mxu0 }
 0x168   :  { %v573_v34 = vmax.f32 %v570_v33, 0.0 }
 0x169   :  { %v816_v58 = vpop.f32.mrf.mxu1 }
 0x16a   :  { %v579_v36 = vmul.f32 %v887_v21, %v573_v34 }
 0x16b   :  { %v712_v38 = vpop.f32.mrf.mxu2  ;;  %v750_v52 = vpop.f32.mrf.mxu3 }
 0x16c   :  { %v713_v39 = vadd.f32 %v712_v38, %v679_v35  ;;  %v583_v40 = vsel %vm117_vm0, %v579_v36, 0.0 }
 0x16d   :  { %584 = vadd.xlane.f32.xlu1 %v583_v40 }
 0x16e   :  { %v745_v43 = vadd.f32 %v744_v37, %v713_v39 }
 0x170   :  { %v784_v45 = vadd.f32 %v783_v41, %v745_v43 }
 0x172   :  { %v813_v47 = vadd.f32 %v812_v44, %v784_v45 }
 0x173   :  { %v717_v49 = vpop.f32.mrf.mxu2 }
 0x174   :  { %v718_v50 = vadd.f32 %v717_v49, %v683_v46  ;;  %v819_v51 = vmax.f32 %v813_v47, 0.0 }
 0x176   :  { %v751_v53 = vadd.f32 %v750_v52, %v718_v50  ;;  %v825_v54 = vmul.f32 %v888_v48, %v819_v51 }
 0x178   :  { %v788_v56 = vadd.f32 %v787_v55, %v751_v53  ;;  %v827_v57 = vsel %vm117_vm0, %v825_v54, 0.0 }
 0x179   :  { %828 = vadd.xlane.f32.xlu0 %v827_v57 }
 0x17a   :  { %v817_v59 = vadd.f32 %v816_v58, %v788_v56 }
 0x17c   :  { %v820_v60 = vmax.f32 %v817_v59, 0.0 }
 0x17e   :  { %v826_v61 = vmul.f32 %v888_v48, %v820_v60 }
 0x180   :  { %v830_v62 = vsel %vm117_vm0, %v826_v61, 0.0 }
 0x181   :  { %831 = vadd.xlane.f32.xlu0 %v830_v62 }
 0x1d8   :  { %v582_v0 = vpop.xlane.xlu1 %581 }
 0x1d9   :  { %v590_v1 = vadd.f32 %v889_v63, %v582_v0 }
 0x1db   :  { %593 = vst.msk [vmem:[%s1210_s11] sm:$0xff] %vm592_vm1, %v590_v1 }
 0x1e0   :  { %v585_v2 = vpop.xlane.xlu1 %584 }
 0x1e1   :  { %v591_v3 = vadd.f32 %v889_v63, %v585_v2 }
 0x1e3   :  { %594 = vst.msk [vmem:[%s1210_s11 + $0x8] sm:$0xff] %vm592_vm1, %v591_v3 }
 0x1ec   :  { %v829_v5 = vpop.xlane.xlu0 %828 }
 0x1ed   :  { %v837_v6 = vadd.f32 %v890_v4, %v829_v5 }
 0x1ef   :  { %v841_v7 = vand.u32 2147483647, %v837_v6  ;;  %v839_v20 = vmax.f32 %v837_v6, 0.0 }
 0x1f1   :  { %v843_v8 = vsub.f32 0.0, %v841_v7 }
 0x1f3   :  { %v845_v9 = vmul.f32 1.442695, %v843_v8 }
 0x1f4   :  { %v832_v10 = vpop.xlane.xlu0 %831 }
 0x1f5   :  { %891 = vpow2.f32 %v845_v9  ;;  %v838_v11 = vadd.f32 %v890_v4, %v832_v10 }
 0x1f7   :  { %v842_v12 = vand.u32 2147483647, %v838_v11  ;;  %v840_v24 = vmax.f32 %v838_v11, 0.0 }
 0x1f9   :  { %v844_v13 = vsub.f32 0.0, %v842_v12 }
 0x1fb   :  { %v892_v14 = vpop.eup %891  ;;  %v847_v15 = vmul.f32 1.442695, %v844_v13 }
 0x1fc   :  { %v849_v16 = vadd.f32 1.0, %v892_v14 }
 0x1fd   :  { %893 = vpow2.f32 %v847_v15 }
 0x1fe   :  { %895 = vlog2.f32 %v849_v16 }
 0x203   :  { %v894_v17 = vpop.eup %893 }
 0x204   :  { %v896_v18 = vpop.eup %895  ;;  %v850_v19 = vadd.f32 1.0, %v894_v17 }
 0x205   :  { %v852_v21 = vmul.f32 0.6931472, %v896_v18 }
 0x206   :  { %897 = vlog2.f32 %v850_v19 }
 0x207   :  { %v855_v22 = vadd.f32 %v852_v21, %v839_v20 }
 0x209   :  { %857 = vst.msk [vmem:[%s1211_s12] sm:$0xff] %vm592_vm1, %v855_v22 }
 0x20c   :  { %v898_v23 = vpop.eup %897 }
 0x20d   :  { %v854_v25 = vmul.f32 0.6931472, %v898_v23 }
 0x20f   :  { %v856_v26 = vadd.f32 %v854_v25, %v840_v24 }
 0x211   :  { %858 = vst.msk [vmem:[%s1211_s12 + $0x8] sm:$0xff] %vm592_vm1, %v856_v26 }
 0x212   :  { %867 = vsyncpa [#allocation5], 1 }
 0x213   :  { %868 = vsyncpa [#allocation7], 1 }
 0x214   :  { %869 = vsyncpa [#allocation10], 1 }

</bundles_post_ra>
